<compile_context>
chip_gen: v5e
topology: v5e:2x2
jax: 0.10.0
libtpu: 0.0.40
codegen_flags: <defaults>
</compile_context>

<pallas_src>
import jax
import jax.numpy as jnp
from jax import lax
from jax.experimental import pallas as pl
from jax.experimental.pallas import tpu as pltpu


def vq_kernel(z_ref, cb_ref, cbsqh_ref, zq_ref, zid_ref):
    # z_ref    : (1, D, tt)  encoder-output tile, native NCL layout & dtype
    # cb_ref   : (D, K)      selected codebook, single resident VMEM copy
    # cbsqh_ref: (1, K)      precomputed 0.5 * ||cb_k||^2   (f32)
    # zq_ref   : (1, D, tt)  quantized output tile (NCL layout)
    # zid_ref  : (1, 1, tt)  selected code ids (lane-dense along tt)
    z = z_ref[0]              # (D, tt) native dtype (bf16 stays bf16 on MXU)
    cb = cb_ref[...]          # (D, K)

    # cross[t, k] = sum_d z[d, t] * cb[d, k]  -> (tt, K) on the MXU, f32 acc.
    cross = lax.dot_general(z, cb, (((0,), (0,)), ((), ())),
                            preferred_element_type=jnp.float32)

    # argmin_k ||z_t - cb_k||^2 == argmax_k (z_t.cb_k - 0.5*||cb_k||^2).
    # The factor 2 is folded into the hoisted norm -> one subtract, no mul.
    score = cross - cbsqh_ref[...]                          # (tt, K) f32

    tt, K = score.shape
    col = lax.broadcasted_iota(jnp.int32, (tt, K), 1)
    row_max = jnp.max(score, axis=1, keepdims=True)         # XLU reduce
    # Masked iota shared by the id path and the gather path; min-reduce gives
    # an explicit first-occurrence tie-break (matches torch.max / argmax).
    masked_iota = jnp.where(score == row_max, col, K)       # (tt, K) i32
    ids = jnp.min(masked_iota, axis=1).astype(jnp.int32)    # (tt,)
    zid_ref[0] = ids[None, :]

    # Exactly-one-hot (even on ties) -> gather the winning codes on the MXU,
    # producing z_q directly in (D, tt) layout (lane-dense store, no cb.T).
    onehot = (masked_iota == ids[:, None]).astype(jnp.float32)   # (tt, K)
    zq = lax.dot_general(cb.astype(jnp.float32), onehot,
                         (((1,), (1,)), ((), ())),
                         preferred_element_type=jnp.float32,
                         precision=lax.Precision.HIGHEST)   # exact codebook rows
    zq_ref[0] = zq.astype(zq_ref.dtype)


def _pick_t_tile(T, K, B):
    """Pick the T tile. Prefer pad-free, lane-dense (multiple-of-128) tiles."""
    # Budget the (tt, K) f32/i32 temporaries: smaller tiles for big codebooks.
    if K >= 4096:
        base = 256
    elif K > 1024:
        base = 512
    else:
        base = 1024

    if T <= base:
        # Single full-width tile; but if the batch axis alone would leave one
        # v7x TensorCore idle, split T into two lane-dense halves.
        if B == 1 and T >= 256 and T % 256 == 0:
            return T // 2, T
        return T, T

    # Largest multiple of 128 that divides T: no pad, no post-slice HBM pass.
    for cand in range(base, 127, -128):
        if T % cand == 0:
            return cand, T

    # Fall back to padding.
    # TODO(synk): mask the ragged last tile in-kernel (lane-iota >= T mask on
    # the stores) instead of padding z_e_x and slicing z_q / z_id afterwards.
    Tp = pl.cdiv(T, base) * base
    return base, Tp


def vq_forward(z_e_x, codebook, codebook_index):
    """JAX/Pallas equivalent of VQ_layer.forward.

    z_e_x:          (B, emb_dim, T)
    codebook:       (n_codebook, emb_dim, n_emb)
    codebook_index: int array with a single entry
    returns (z_q, z_id) with shapes (B, emb_dim, T) and (B, T)
    """
    cb = codebook[codebook_index[0]]          # (D, K) == index_select + squeeze(0)
    B, D, T = z_e_x.shape
    K = cb.shape[1]

    tt, Tp = _pick_t_tile(T, K, B)
    n_t = Tp // tt
    z_in = z_e_x if Tp == T else jnp.pad(z_e_x, ((0, 0), (0, 0), (0, Tp - T)))

    # Hoisted constant: 0.5*||cb_k||^2 in f32 (folds the "2*" out of the kernel).
    cb_f32 = cb.astype(jnp.float32)
    cb_sq_half = 0.5 * jnp.sum(cb_f32 * cb_f32, axis=0, keepdims=True)   # (1, K)

    z_item = jnp.dtype(z_e_x.dtype).itemsize
    cb_item = jnp.dtype(cb.dtype).itemsize
    # VMEM budget: single-buffered codebook + norms, double-buffered z / z_q /
    # z_id tiles, plus ~4 live (tt, K) f32/i32 temporaries (score, iota, onehot).
    vmem_est = (D * K * cb_item + K * 4
                + 2 * D * tt * z_item          # z_e_x tiles (double-buffered)
                + 2 * D * tt * z_item          # z_q tiles
                + 2 * tt * 4                   # z_id tiles
                + 4 * tt * K * 4)              # (tt, K) temporaries
    # >= default scoped limits (16/32 MiB), <= 48 MiB so it also leaves
    # pipeline headroom on v7x's 64 MiB-per-core VMEM.
    vmem_limit = int(min(max(vmem_est * 5 // 4 + (2 << 20), 32 << 20), 48 << 20))

    cost = pl.CostEstimate(
        flops=4 * B * Tp * D * K,                       # distance + gather matmuls
        transcendentals=0,
        bytes_accessed=(2 * B * D * Tp * z_item + D * K * cb_item
                        + K * 4 + B * Tp * 4))

    z_q_p, z_id_p = pl.pallas_call(
        vq_kernel,
        out_shape=(
            jax.ShapeDtypeStruct((B, D, Tp), z_e_x.dtype),
            jax.ShapeDtypeStruct((B, 1, Tp), jnp.int32),
        ),
        grid_spec=pltpu.PrefetchScalarGridSpec(
            num_scalar_prefetch=0,
            grid=(B, n_t),
            in_specs=[
                # z tile: blocked + auto-pipelined.
                pl.BlockSpec((1, D, tt), lambda b, j: (b, 0, j)),
                # Codebook + norms: grid-invariant -> whole-array resident in
                # VMEM (single copy, no per-step re-DMA, no double buffer).
                pl.BlockSpec(memory_space=pltpu.MemorySpace.VMEM),
                pl.BlockSpec(memory_space=pltpu.MemorySpace.VMEM),
            ],
            out_specs=[
                pl.BlockSpec((1, D, tt), lambda b, j: (b, 0, j)),   # z_q tile
                pl.BlockSpec((1, 1, tt), lambda b, j: (b, 0, j)),   # z_id tile
            ],
        ),
        compiler_params=pltpu.CompilerParams(
            dimension_semantics=("parallel", "parallel"),
            vmem_limit_bytes=vmem_limit),
        cost_estimate=cost,
    )(z_in, cb, cb_sq_half)

    if Tp == T:
        return z_q_p, z_id_p[:, 0, :]
    return z_q_p[:, :, :T], z_id_p[:, 0, :T]


def vq_reference(z_e_x, codebook, codebook_index):
    """Pure-JAX reference mirroring the PyTorch code, for validation."""
    cb = codebook[codebook_index[0]]
    B, D, T = z_e_x.shape
    z_flat = jnp.transpose(z_e_x, (0, 2, 1)).reshape(-1, D)
    dist2 = (jnp.sum(z_flat ** 2, axis=1, keepdims=True)
             - 2.0 * (z_flat @ cb)
             + jnp.sum(cb ** 2, axis=0))
    z_id_flat = jnp.argmax(-dist2, axis=1)
    z_id = z_id_flat.reshape(B, T)
    z_q_flat = cb.T[z_id_flat]
    z_q = jnp.transpose(z_q_flat.reshape(B, T, D), (0, 2, 1))
    return z_q, z_id


if __name__ == "__main__":
    emb_dim = 32      # D
    n_emb = 128       # K
    n_codebook = 3
    B, T = 2, 16

    key = jax.random.PRNGKey(0)
    k_cb, k_z = jax.random.split(key)

    # Deterministic parameter init matching nn.init uniform_(-1/n_emb, 1/n_emb)
    codebook = jax.random.uniform(
        k_cb, (n_codebook, emb_dim, n_emb),
        minval=-1.0 / n_emb, maxval=1.0 / n_emb, dtype=jnp.float32)

    z_e_x = jax.random.normal(k_z, (B, emb_dim, T), dtype=jnp.float32)
    codebook_index = jnp.array([1], dtype=jnp.int32)

    z_q, z_id = vq_forward(z_e_x, codebook, codebook_index)
    jax.block_until_ready((z_q, z_id))

    z_q_ref, z_id_ref = vq_reference(z_e_x, codebook, codebook_index)

    assert z_q.shape == (B, emb_dim, T) and z_id.shape == (B, T)
    assert jnp.array_equal(z_id, z_id_ref.astype(z_id.dtype))
    assert jnp.allclose(z_q, z_q_ref, atol=1e-6, rtol=1e-6)

    print("KERNEL_OK")
</pallas_src>

<mosaic_0001>
module attributes {stable_mosaic.version = 11 : i64} {
  func.func @vq_kernel(%arg0: i32, %arg1: i32, %arg2: memref<1x32x16xf32, #tpu.memory_space<vmem>>, %arg3: memref<32x128xf32, #tpu.memory_space<vmem>>, %arg4: memref<1x128xf32, #tpu.memory_space<vmem>>, %arg5: memref<1x32x16xf32, #tpu.memory_space<vmem>>, %arg6: memref<1x1x16xi32, #tpu.memory_space<vmem>>) attributes {dimension_semantics = [#tpu.dimension_semantics<parallel>, #tpu.dimension_semantics<parallel>], iteration_bounds = array<i64: 2, 1>, scalar_prefetch = 0 : i64, scratch_operands = 0 : i64, tpu.core_type = #tpu.core_type<tc>, window_params = [{transform_indices = @transform_0, window_bounds = array<i64: 1, 32, 16>}, {pipeline_mode = #tpu.pipeline_mode<synchronous>, transform_indices = @transform_1, window_bounds = array<i64: 32, 128>}, {pipeline_mode = #tpu.pipeline_mode<synchronous>, transform_indices = @transform_2, window_bounds = array<i64: 1, 128>}, {transform_indices = @transform_3, window_bounds = array<i64: 1, 32, 16>}, {transform_indices = @transform_4, window_bounds = array<i64: 1, 1, 16>}]} {
    %c0 = arith.constant 0 : index
    %c0_0 = arith.constant 0 : index
    %c0_1 = arith.constant 0 : index
    %0 = vector.load %arg2[%c0, %c0_0, %c0_1] : memref<1x32x16xf32, #tpu.memory_space<vmem>>, vector<1x32x16xf32>
    %1 = vector.shape_cast %0 : vector<1x32x16xf32> to vector<32x16xf32>
    %c0_2 = arith.constant 0 : index
    %c0_3 = arith.constant 0 : index
    %2 = vector.load %arg3[%c0_2, %c0_3] : memref<32x128xf32, #tpu.memory_space<vmem>>, vector<32x128xf32>
    %cst = arith.constant dense<0.000000e+00> : vector<16x128xf32>
    %3 = tpu.matmul %1, %2, %cst {dimension_numbers = #tpu.dot_dimension_numbers<[0], [0], [1], [1], [0, 1, 1, 1], [], []>} : vector<32x16xf32>, vector<32x128xf32>, vector<16x128xf32> -> vector<16x128xf32>
    %c0_4 = arith.constant 0 : index
    %c0_5 = arith.constant 0 : index
    %4 = vector.load %arg4[%c0_4, %c0_5] : memref<1x128xf32, #tpu.memory_space<vmem>>, vector<1x128xf32>
    %5 = vector.broadcast %4 : vector<1x128xf32> to vector<16x128xf32>
    %6 = arith.subf %3, %5 : vector<16x128xf32>
    %7 = tpu.iota {dimensions = array<i32: 1>} : vector<16x128xi32>
    %cst_6 = arith.constant dense<0xFF800000> : vector<16xf32>
    %8 = vector.multi_reduction <maximumf>, %6, %cst_6 [1] : vector<16x128xf32> to vector<16xf32>
    %9 = vector.shape_cast %8 : vector<16xf32> to vector<16x1xf32>
    %10 = vector.broadcast %9 : vector<16x1xf32> to vector<16x128xf32>
    %11 = arith.cmpf oeq, %6, %10 : vector<16x128xf32>
    %c128_i32 = arith.constant 128 : i32
    %12 = vector.broadcast %c128_i32 : i32 to vector<16x128xi32>
    %13 = arith.select %11, %7, %12 : vector<16x128xi1>, vector<16x128xi32>
    %cst_7 = arith.constant dense<2147483647> : vector<16xi32>
    %14 = vector.multi_reduction <minsi>, %13, %cst_7 [1] : vector<16x128xi32> to vector<16xi32>
    %15 = vector.shape_cast %14 : vector<16xi32> to vector<1x16xi32>
    %c0_8 = arith.constant 0 : index
    %c0_9 = arith.constant 0 : index
    %c0_10 = arith.constant 0 : index
    %16 = vector.load %arg6[%c0_8, %c0_9, %c0_10] : memref<1x1x16xi32, #tpu.memory_space<vmem>>, vector<1x1x16xi32>
    %17 = vector.shape_cast %16 : vector<1x1x16xi32> to vector<1x16xi32>
    %18 = vector.shape_cast %15 : vector<1x16xi32> to vector<1x1x16xi32>
    tpu.vector_store %arg6[%c0_8, %c0_9, %c0_10], %18 {strides = array<i32>} : memref<1x1x16xi32, #tpu.memory_space<vmem>>, vector<1x1x16xi32>,
    %19 = vector.shape_cast %14 : vector<16xi32> to vector<16x1xi32>
    %20 = vector.broadcast %19 : vector<16x1xi32> to vector<16x128xi32>
    %21 = arith.cmpi eq, %13, %20 : vector<16x128xi32>
    %22 = arith.extui %21 : vector<16x128xi1> to vector<16x128xi32>
    %23 = arith.sitofp %22 : vector<16x128xi32> to vector<16x128xf32>
    %cst_11 = arith.constant dense<0.000000e+00> : vector<32x16xf32>
    %24 = tpu.matmul %2, %23, %cst_11 {dimension_numbers = #tpu.dot_dimension_numbers<[1], [1], [0], [0], [0, 0, 1, 0], [], []>, precision = #tpu.contract_precision<fp32>} : vector<32x128xf32>, vector<16x128xf32>, vector<32x16xf32> -> vector<32x16xf32>
    %c0_12 = arith.constant 0 : index
    %c0_13 = arith.constant 0 : index
    %c0_14 = arith.constant 0 : index
    %25 = vector.load %arg5[%c0_12, %c0_13, %c0_14] : memref<1x32x16xf32, #tpu.memory_space<vmem>>, vector<1x32x16xf32>
    %26 = vector.shape_cast %25 : vector<1x32x16xf32> to vector<32x16xf32>
    %27 = vector.shape_cast %24 : vector<32x16xf32> to vector<1x32x16xf32>
    tpu.vector_store %arg5[%c0_12, %c0_13, %c0_14], %27 {strides = array<i32>} : memref<1x32x16xf32, #tpu.memory_space<vmem>>, vector<1x32x16xf32>,
    return
  }
  func.func @transform_0(%arg0: i32, %arg1: i32) -> (i32, i32, i32) {
    %c0_i32 = arith.constant 0 : i32
    %c0_i32_0 = arith.constant 0 : i32
    return %arg0, %c0_i32, %arg1 : i32, i32, i32
  }
  func.func @transform_1(%arg0: i32, %arg1: i32) -> (i32, i32) {
    %c0_i32 = arith.constant 0 : i32
    %c0_i32_0 = arith.constant 0 : i32
    %c0_i32_1 = arith.constant 0 : i32
    return %c0_i32, %c0_i32_0 : i32, i32
  }
  func.func @transform_2(%arg0: i32, %arg1: i32) -> (i32, i32) {
    %c0_i32 = arith.constant 0 : i32
    %c0_i32_0 = arith.constant 0 : i32
    %c0_i32_1 = arith.constant 0 : i32
    return %c0_i32, %c0_i32_0 : i32, i32
  }
  func.func @transform_3(%arg0: i32, %arg1: i32) -> (i32, i32, i32) {
    %c0_i32 = arith.constant 0 : i32
    %c0_i32_0 = arith.constant 0 : i32
    return %arg0, %c0_i32, %arg1 : i32, i32, i32
  }
  func.func @transform_4(%arg0: i32, %arg1: i32) -> (i32, i32, i32) {
    %c0_i32 = arith.constant 0 : i32
    %c0_i32_0 = arith.constant 0 : i32
    return %arg0, %c0_i32, %arg1 : i32, i32, i32
  }
}

</mosaic_0001>

<bundles_post_ra>
// kernel: tpu_custom_call.1
= control target key start
LH: loop header
LB: loop body
LE: loop exit
PB: predicated region body
PF: predicated region fallthrough
CT: control target
= control target key end

     0   :  { %10 = vsyncpa [#allocation3], 0  ;;  %s1165_s0 = inlined_call_operand.vmem [shape: f32[2,32,16], index: 0, kind: input, shape index: {}]   ;;  %s1166_s1 = inlined_call_operand.vmem [shape: f32[32,128], index: 1, kind: input, shape index: {}]   ;;  %s1167_s2 = inlined_call_operand.vmem [shape: f32[1,128], index: 2, kind: input, shape index: {}]   ;;  %s1168_s3 = inlined_call_operand.vmem [shape: f32[2,32,16], index: 3, kind: output, shape index: {0}]   ;;  %s1169_s4 = inlined_call_operand.hbm [shape: s32[2,1,16], index: 4, kind: output, shape index: {1}]  }
   0x1   :  { %12 = vsyncpa [#allocation3 + $0x1], 0  ;;  %s948_s15 = smov 0   ;;  %s950_s16 = smov 0  }
   0x2   :  { %s952_s17 = smov 0   ;;  %s954_s18 = smov 0  }
   0x3   :  { %s956_s19 = smov 0   ;;  %s958_s20 = smov 0  }
   0x4 LB: > { %s756_s21 = sadd.s32 4294967295, %s919_s20   ;;  %s757_s22 = sadd.s32 4294967294, %s919_s20   ;;  %s919_s20 = sphi %s958_s20, %s18_s20   ;;  %s915_s19 = sphi %s956_s19, %s1180_s19   ;;  %s911_s18 = sphi %s954_s18, %s1179_s18   ;;  %s907_s17 = sphi %s952_s17, %s1178_s17   ;;  %s903_s16 = sphi %s950_s16, %s1177_s16   ;;  %s899_s15 = sphi %s948_s15, %s1176_s15  }
   0x5   : > { %s30_s23 = sadd.s32 1, %s915_s19  ;;  %s137_s24 = sadd.s32 1, %s907_s17 }
   0x6   : > { %p32_p0 = scmp.ge.s32.totalorder %s30_s23, 2  ;;  %p147_p1 = scmp.ne.s32.totalorder %s907_s17, %s903_s16 }
   0x7   : > { %p148_p2 = scmp.eq.s32.totalorder %s756_s21, 1  ;;  %p153_p3 = scmp.ne.s32.totalorder %s903_s16, %s899_s15 }
   0x8   : > { %s1182_s23 = smov (%p32_p0, %s30_s23), 0  ;;  %p154_p5 = scmp.eq.s32.totalorder %s757_s22, 1 }
   0x9   : > { %p988_p4 = por %p148_p2, %p147_p1  ;;  %s132_s26 = ssub.s32 %s915_s19, %s1182_s23 }
   0xa   : > { %p760_p6 = scmp.ge.s32.totalorder %s919_s20, 1  ;;  %p135_p7 = scmp.eq.s32.totalorder %s132_s26, 0 }
   0xb   : > { %p995_p8 = por %p154_p5, %p153_p3  ;;  %p189_p9 = scmp.lt.s32.totalorder %s919_s20, 3 }
   0xc   : > { %s1001_s28 = scalar_select %p135_p7, %s907_s17, %s137_s24  }
   0xd   : > { %p190_p10 = pnand %p760_p6, %p189_p9 }
   0xe   : > { %p225_p11 = scmp.lt.s32.totalorder (!%p190_p10), %s911_s18, 1  ;;  %s223_s26 = sand.u32 (!%p190_p10), 1, %s903_s16  }
   0xf   : > { %193 = sbr.rel (%p190_p10) target bundleno = 890 (0x37a), region = 32  ;;  %s1090_s29 = scalar_lea.vmem (!%p190_p10), [#allocation2], %s223_s26 }
  0x10   : > { %s646_s6 = scalar_lea.hbm (!%p190_p10), %s1169_s4, %s911_s18  ;;  %s648_s8 = sshll.u32 (!%p190_p10), %s1090_s29, 4  ;;  %s649_s8 = int_to_ptr.vmem [resolvable:$true] %s648_s8 }
  0x11   : > { %s650_s9 = sshll.u32 (!%p190_p10), %s646_s6, 4  ;;  %s634_s11 = scalar_lea.sflag (!%p190_p10), [#allocation3], %s223_s26  ;;  %s651_s9 = int_to_ptr.hbm [resolvable:$true] %s650_s9 }
  0x12   : > { %s855_s12 = sshra.s32 (!%p190_p10), %s651_s9, 4  ;;  %s861_s22 = scalar_lea.hbm (!%p190_p10), %s1169_s4, 2  ;;  %s856_s12 = int_to_ptr.hbm [resolvable:$true] %s855_s12 }
  0x13   : > { %s857_s13 = scalar_lea.hbm (!%p190_p10), %s856_s12, 1  ;;  %p862_p1 = scmp.lt.s32.totalorder (!%p190_p10), %s856_s12, %s1169_s4 }
  0x14   : > { %v1007_v0 = vld [vmem:[%s1166_s1 + $0x18] sm:$0xff]  ;;  %v1012_v1 = vld [vmem:[%s1166_s1 + $0x10] sm:$0xff]  ;;  %s1016_s7 = scalar_select %p225_p11, %s911_s18, 1  ;;  %v246_v2 = vld [vmem:[%s1166_s1 + $0x8] sm:$0xff]  ;;  %vm281_vm0 = vcmask 261120   ;;  %v317_v15 = vlaneseq  ;;  %v921_v47 = vmov 1.0  }
  0x15   : > { %300 = vmatpush.msra.mxu0 %v1007_v0  ;;  %v245_v3 = vld [vmem:[%s1166_s1] sm:$0xff]  ;;  %v1038_v33 = vand.u32 4294901760, %v246_v2  ;;  %v1049_v42 = vand.u32 4294901760, %v1012_v1  ;;  %v922_v48 = vmov 0.0   ;;  %v410_v59 = vand.u32 4294901760, %v1007_v0  ;;  %p858_p12 = scmp.ne.s32.totalorder %s856_s12, %s857_s13  ;;  %p863_p2 = scmp.lt.s32.totalorder %s861_s22, %s857_s13 }
  0x16   : > { %s777_s10 = sshll.u32 %s1016_s7, 5  ;;  %v840_v11 = vld [vmem:[%s1167_s2] ss:$0 sm:$0xff]  ;;  %v1034_v16 = vand.u32 127, %v317_v15  ;;  %v1040_v34 = vand.u32 4294901760, %v245_v3  ;;  %vm358_vm6 = vcmask 130112  }
  0x17   : > { %301 = vmatpush.msra.mxu0 %v1012_v1  ;;  %s232_s21 = scalar_lea.vmem %s1165_s0, %s777_s10  ;;  %v1043_v36 = vsub.f32 %v246_v2, %v1038_v33  ;;  %v1067_v51 = vsub.f32 %v1012_v1, %v1049_v42  ;;  %vm360_vm7 = vcmask 122880   ;;  %p859_p13 = pnand %p858_p12, %p988_p4 }
  0x18   : > { %v241_v4 = vld [vmem:[%s232_s21] sm:$0xff]  ;;  %v242_v5 = vld [vmem:[%s232_s21 + $0x8] sm:$0xff]  ;;  %v243_v6 = vld [vmem:[%s232_s21 + $0x10] sm:$0xff]  ;;  %v1046_v37 = vsub.f32 %v245_v3, %v1040_v34  ;;  %v356_v56 = vadd.s32 4294967288, %v1034_v16  ;;  %p864_p3 = por %p863_p2, %p862_p1 }
  0x19   : > { %302 = vmatpush.msra.mxu0 %v246_v2  ;;  %249 = vxpose.xlu0.b32.start [1/4] (short) (narrow) %v241_v4, 16  ;;  %v244_v7 = vld [vmem:[%s232_s21 + $0x18] sm:$0xff]  ;;  %v396_v43 = vand.u32 4294901760, %v1043_v36  ;;  %v404_v1 = vand.u32 4294901760, %v1067_v51  ;;  %p860_p0 = pneg %p859_p13 }
  0x1a   : > { %v388_v44 = vand.u32 4294901760, %v1046_v37 }
  0x1b   : > { %303 = vmatpush.msra.mxu0 %v245_v3  ;;  %v397_v53 = vsub.f32 %v1043_v36, %v396_v43  ;;  %p865_p5 = pnand %p864_p3, %p860_p0 }
  0x1c   : > { %v389_v54 = vsub.f32 %v1046_v37, %v388_v44 }
  0x1d   : > { %v398_v62 = vand.u32 4294901760, %v397_v53 }
  0x1e   : > { %v390_v63 = vand.u32 4294901760, %v389_v54 }
  0x21   : > { %250 = vxpose.xlu0.b32.cont [2/4] (short) (narrow) %v242_v5, 16 }
  0x29   : > { %251 = vxpose.xlu0.b32.cont [3/4] (short) (narrow) %v243_v6, 16 }
  0x31   : > { %252 = vxpose.xlu0.b32.end [4/4] (short) (narrow) %v244_v7, 16 }
  0xbd   : > { %v265_v8 = vpop.trf.xlu0 }
  0xbe   : > { %765 = vmatmul.msk.f32.vlgmr.msra.gmra.mxu0 %vm281_vm0, %v265_v8 }
  0xc5   : > { %v266_v9 = vpop.trf.xlu0 }
  0xc6   : > { %766 = vmatmul.msk.f32.gmra.mxu0 %vm281_vm0, %v266_v9  ;;  %v411_v9 = vsub.f32 %v1007_v0, %v410_v59 }
  0xc8   : > { %v412_v15 = vand.u32 4294901760, %v411_v9 }
 0x13b   : > { %v305_v10 = vpop.f32.mrf.mxu0 }
 0x13c   : > { %v315_v14 = vsub.f32 %v305_v10, %v840_v11 }
 0x143   : > { %v308_v12 = vpop.f32.mrf.mxu0 }
 0x144   : > { %v316_v13 = vsub.f32 %v308_v12, %v840_v11  ;;  %v405_v11 = vsub.f32 %v1067_v51, %v404_v1 }
 0x146   : > { %321 = vmax.xlane.f32.xlu1 %v316_v13 }
 0x14e   : > { %319 = vmax.xlane.f32.xlu1 %v315_v14 }
 0x1b9   : > { %v322_v17 = vpop.xlane.xlu1 %321 }
 0x1ba   : > { %vm324_vm1 = vcmp.eq.f32.partialorder %v316_v13, %v322_v17 }
 0x1bb   : > { %v326_v18 = vsel %vm324_vm1, %v1034_v16, 128 }
 0x1bc   : > { %v342_v19 = vshra.s32 %v326_v18, 16  ;;  %v341_v25 = vand.u32 65535, %v326_v18 }
 0x1be   : > { %v344_v20 = vcvt.s32.f32 %v342_v19  ;;  %v343_v27 = vcvt.s32.f32 %v341_v25 }
 0x1c0   : > { %345 = vmin.xlane.f32.xlu2 %v344_v20 }
 0x1c1   : > { %v320_v21 = vpop.xlane.xlu1 %319 }
 0x1c2   : > { %vm323_vm2 = vcmp.eq.f32.partialorder %v315_v14, %v320_v21  ;;  %v406_v14 = vand.u32 4294901760, %v405_v11 }
 0x1c3   : > { %v325_v22 = vsel %vm323_vm2, %v1034_v16, 128 }
 0x1c4   : > { %v328_v23 = vshra.s32 %v325_v22, 16  ;;  %v327_v29 = vand.u32 65535, %v325_v22 }
 0x1c6   : > { %v330_v24 = vcvt.s32.f32 %v328_v23  ;;  %v329_v31 = vcvt.s32.f32 %v327_v29 }
 0x1c8   : > { %331 = vmin.xlane.f32.xlu2 %v330_v24 }
 0x233   : > { %v346_v26 = vpop.xlane.xlu2 %345 }
 0x234   : > { %vm347_vm3 = vcmp.eq.f32.partialorder %v344_v20, %v346_v26  ;;  %v352_v35 = vcvt.f32.s32 %v346_v26 }
 0x235   : > { %v348_v28 = vsel %vm347_vm3, %v343_v27, inf }
 0x236   : > { %349 = vmin.xlane.f32.xlu1 %v348_v28  ;;  %v353_v39 = vshll.u32 %v352_v35, 16 }
 0x23b   : > { %v332_v30 = vpop.xlane.xlu2 %331 }
 0x23c   : > { %vm333_vm4 = vcmp.eq.f32.partialorder %v330_v24, %v332_v30  ;;  %v338_v45 = vcvt.f32.s32 %v332_v30 }
 0x23d   : > { %v334_v32 = vsel %vm333_vm4, %v329_v31, inf }
 0x23e   : > { %335 = vmin.xlane.f32.xlu2 %v334_v32  ;;  %v339_v55 = vshll.u32 %v338_v45, 16 }
 0x2a9   : > { %v350_v38 = vpop.xlane.xlu1 %349 }
 0x2aa   : > { %v351_v40 = vcvt.f32.s32 %v350_v38 }
 0x2ac   : > { %v354_v41 = vadd.s32 %v353_v39, %v351_v40 }
 0x2ae   : > { %vm1053_vm5 = vcmp.eq.s32.totalorder %v326_v18, %v354_v41  ;;  %v357_v2 = vperm.slane %v354_v41, %v356_v56 }
 0x2af   : > { %769 = vmatpush.xpose.msk.msra.mxu1 %vm1053_vm5, %v921_v47  ;;  %779 = vmatpush.xpose.msk.msra.mxu3 %vm1053_vm5, %v921_v47  ;;  %v768_v49 = vsel %vm1053_vm5, 1.0, %v922_v48 }
 0x2b0   : > { %771 = vmatpush.xpose.msk.msrb.mxu0 %vm1053_vm5, %v921_v47  ;;  %v434_v50 = vsub.f32 %v768_v49, %v768_v49 }
 0x2b1   : > { %v336_v52 = vpop.xlane.xlu2 %335 }
 0x2b2   : > { %v337_v57 = vcvt.f32.s32 %v336_v52  ;;  %v435_v58 = vand.u32 4294901760, %v434_v50 }
 0x2b4   : > { %v340_v60 = vadd.s32 %v339_v55, %v337_v57  ;;  %v436_v61 = vsub.f32 %v434_v50, %v435_v58 }
 0x2b6   : > { %v355_v3 = vperm.slane %v340_v60, %v1034_v16  ;;  %vm1076_vm8 = vcmp.eq.s32.totalorder %v325_v22, %v340_v60  ;;  %v437_v5 = vand.u32 4294901760, %v436_v61  ;;  %v413_v16 = vsub.f32 %v411_v9, %v412_v15 }
 0x2b7   : > { %770 = vmatpush.xpose.msk.msra.mxu1 %vm1076_vm8, %v921_v47  ;;  %780 = vmatpush.xpose.msk.msra.mxu3 %vm1076_vm8, %v921_v47  ;;  %v767_v6 = vsel %vm1076_vm8, 1.0, %v922_v48 }
 0x2b8   : > { %772 = vmatpush.xpose.msk.msrb.mxu0 %vm1076_vm8, %v921_v47  ;;  %v440_v7 = vsub.f32 %v767_v6, %v767_v6  ;;  %v359_v8 = vsel %vm358_vm6, %v357_v2, %v355_v3  ;;  %781 = vmatpush.xpose.msra.mxu2 %v437_v5  ;;  %v414_v0 = vand.u32 4294901760, %v413_v16 }
 0x2b9   : > { %361 = vst.msk [vmem:[%s1090_s29] sm:$0x1] %vm360_vm7, %v359_v8 }
 0x2ba   : > { %399 = vmatmul.f32.vlgmr.msra.gmra.mxu3 %v398_v62  ;;  %v441_v10 = vand.u32 4294901760, %v440_v7  ;;  %391 = vmatmul.f32.vlgmr.msra.gmra.mxu1 %v390_v63 }
 0x2bb   : > { %438 = vmatpush.xpose.msrb.mxu1 %v437_v5  ;;  %478 = vmatpush.xpose.msrb.mxu3 %v434_v50 }
 0x2bc   : > { %524 = vmatmul.f32.vlgmr.msrb.gmra.mxu0 %v388_v44  ;;  %v442_v12 = vsub.f32 %v440_v7, %v441_v10 }
 0x2be   : > { %v443_v13 = vand.u32 4294901760, %v442_v12 }
 0x2bf   : > { %481 = vmatpush.xpose.msrb.mxu3 %v440_v7 }
 0x2c0   : > { %444 = vmatpush.xpose.msrb.mxu1 %v443_v13  ;;  %782 = vmatpush.xpose.msra.mxu2 %v443_v13 }
 0x2c2   : > { %407 = vmatmul.f32.gmra.mxu3 %v406_v14 }
 0x2c3   : > { %450 = vmatmul.f32.vlgmr.msra.gmra.mxu2 %v1038_v33  ;;  %446 = vmatmul.f32.vlgmr.msrb.gmra.mxu1 %v1040_v34 }
 0x2c4   : > { %563 = vmatpush.xpose.msra.mxu1 %v435_v58  ;;  %773 = vmatpush.xpose.msk.msrb.mxu2 %vm1053_vm5, %v921_v47 }
 0x2c5   : > { %530 = vmatmul.f32.gmra.mxu0 %v396_v43 }
 0x2c8   : > { %567 = vmatpush.xpose.msra.mxu1 %v441_v10  ;;  %774 = vmatpush.xpose.msk.msrb.mxu2 %vm1076_vm8, %v921_v47 }
 0x2ca   : > { %415 = vmatmul.f32.gmra.mxu3 %v414_v0 }
 0x2cb   : > { %454 = vmatmul.f32.gmra.mxu2 %v1049_v42  ;;  %569 = vmatmul.f32.vlgmr.msra.gmra.mxu1 %v1040_v34 }
 0x2cd   : > { %536 = vmatmul.f32.gmra.mxu0 %v404_v1 }
 0x2d2   : > { %484 = vmatmul.f32.vlgmr.msrb.gmra.mxu3 %v1046_v37 }
 0x2d3   : > { %458 = vmatmul.f32.gmra.mxu2 %v410_v59  ;;  %573 = vmatmul.f32.gmra.mxu1 %v1038_v33 }
 0x2d5   : > { %542 = vmatmul.f32.gmra.mxu0 %v412_v15 }
 0x2da   : > { %489 = vmatmul.f32.gmra.mxu3 %v1043_v36 }
 0x2db   : > { %604 = vmatmul.f32.vlgmr.msrb.gmra.mxu2 %v1040_v34  ;;  %577 = vmatmul.f32.gmra.mxu1 %v1049_v42 }
 0x2e2   : > { %494 = vmatmul.f32.gmra.mxu3 %v1067_v51 }
 0x2e3   : > { %608 = vmatmul.f32.gmra.mxu2 %v1038_v33  ;;  %581 = vmatmul.f32.gmra.mxu1 %v410_v59 }
 0x2ea   : > { %499 = vmatmul.f32.gmra.mxu3 %v411_v9 }
 0x2eb   : > { %612 = vmatmul.f32.gmra.mxu2 %v1049_v42 }
 0x2f3   : > { %616 = vmatmul.f32.gmra.mxu2 %v410_v59 }
 0x2f4   : > { %868 = shalt.err (!%p865_p5)
}
 0x2f5   : > { %783 = dma.vmem_to_hbm [thread:$0]  (%p988_p4), %s649_s8, 16, %s651_s9, %s634_s11   ;;  %vm620_vm9 = vcmask 130048  }
 0x2f6   : > { %s1133_s26 = scalar_lea.vmem %s1168_s3, %s777_s10 }
 0x337   : > { %v392_v18 = vpop.f32.mrf.mxu1 }
 0x339   : > { %v525_v24 = vpop.f32.mrf.mxu0 }
 0x33d   : > { %v400_v17 = vpop.f32.mrf.mxu3 }
 0x340   : > { %v447_v21 = vpop.f32.mrf.mxu1 }
 0x341   : > { %v448_v25 = vadd.f32 %v447_v21, %v392_v18 }
 0x342   : > { %v531_v31 = vpop.f32.mrf.mxu0 }
 0x345   : > { %v408_v19 = vpop.f32.mrf.mxu3 }
 0x346   : > { %v451_v20 = vpop.f32.mrf.mxu2 }
 0x347   : > { %v452_v32 = vadd.f32 %v451_v20, %v400_v17 }
 0x348   : > { %v570_v26 = vpop.f32.mrf.mxu1 }
 0x34a   : > { %v537_v41 = vpop.f32.mrf.mxu0 }
 0x34d   : > { %v416_v22 = vpop.f32.mrf.mxu3 }
 0x34e   : > { %v455_v23 = vpop.f32.mrf.mxu2 }
 0x34f   : > { %v456_v40 = vadd.f32 %v455_v23, %v408_v19 }
 0x350   : > { %v574_v37 = vpop.f32.mrf.mxu1 }
 0x352   : > { %v543_v54 = vpop.f32.mrf.mxu0 }
 0x355   : > { %v485_v27 = vpop.f32.mrf.mxu3 }
 0x356   : > { %v486_v28 = vadd.f32 %v485_v27, %v448_v25  ;;  %v459_v29 = vpop.f32.mrf.mxu2 }
 0x357   : > { %v460_v49 = vadd.f32 %v459_v29, %v416_v22 }
 0x358   : > { %v526_v30 = vadd.f32 %v525_v24, %v486_v28  ;;  %v578_v47 = vpop.f32.mrf.mxu1 }
 0x35a   : > { %v571_v33 = vadd.f32 %v570_v26, %v526_v30 }
 0x35d   : > { %v490_v34 = vpop.f32.mrf.mxu3 }
 0x35e   : > { %v491_v35 = vadd.f32 %v490_v34, %v452_v32  ;;  %v605_v36 = vpop.f32.mrf.mxu2 }
 0x35f   : > { %v606_v38 = vadd.f32 %v605_v36, %v571_v33 }
 0x360   : > { %v532_v39 = vadd.f32 %v531_v31, %v491_v35  ;;  %v582_v57 = vpop.f32.mrf.mxu1 }
 0x361   : > { %621 = vst.msk [vmem:[%s1133_s26] sm:$0xff] %vm620_vm9, %v606_v38 }
 0x362   : > { %v575_v42 = vadd.f32 %v574_v37, %v532_v39 }
 0x365   : > { %v495_v43 = vpop.f32.mrf.mxu3 }
 0x366   : > { %v496_v44 = vadd.f32 %v495_v43, %v456_v40  ;;  %v609_v45 = vpop.f32.mrf.mxu2 }
 0x367   : > { %v610_v46 = vadd.f32 %v609_v45, %v575_v42 }
 0x368   : > { %v538_v48 = vadd.f32 %v537_v41, %v496_v44 }
 0x369   : > { %622 = vst.msk [vmem:[%s1133_s26 + $0x8] sm:$0xff] %vm620_vm9, %v610_v46 }
 0x36a   : > { %v579_v50 = vadd.f32 %v578_v47, %v538_v48 }
 0x36d   : > { %v500_v51 = vpop.f32.mrf.mxu3 }
 0x36e   : > { %v501_v52 = vadd.f32 %v500_v51, %v460_v49  ;;  %v613_v53 = vpop.f32.mrf.mxu2 }
 0x36f   : > { %v614_v55 = vadd.f32 %v613_v53, %v579_v50 }
 0x370   : > { %v544_v56 = vadd.f32 %v543_v54, %v501_v52 }
 0x371   : > { %623 = vst.msk [vmem:[%s1133_s26 + $0x10] sm:$0xff] %vm620_vm9, %v614_v55 }
 0x372   : > { %v583_v58 = vadd.f32 %v582_v57, %v544_v56 }
 0x376   : > { %v617_v59 = vpop.f32.mrf.mxu2 }
 0x377   : > { %v618_v60 = vadd.f32 %v617_v59, %v583_v58 }
 0x379   : > { %624 = vst.msk [vmem:[%s1133_s26 + $0x18] sm:$0xff] %vm620_vm9, %v618_v60 }
 0x37a PF: > { %p789_p4 = scmp.ge.s32.totalorder %s919_s20, 2  ;;  %s673_s7 = sand.u32 1, %s899_s15  }
 0x37b   : > { %s674_s10 = scalar_lea.sflag [#allocation3], %s673_s7 }
 0x37c   : > { %p786_p6 = pnand %p789_p4, %p995_p8 }
 0x37e   : > { %p787_p7 = pneg %p786_p6 }
 0x380   : > { %894 = dma.done.wait (%p787_p7), %s674_s10, 16  }
 0x381   : > { %896 = vsyncadd (%p787_p7), %s674_s10, 4294967280  ;;  %s18_s20 = sadd.s32 1, %s919_s20   ;;  %s1176_s15 = smov %s903_s16 }
 0x382   : > { %p15_p9 = scmp.ge.s32.totalorder %s18_s20, 4   ;;  %s1177_s16 = smov %s907_s17 }
 0x383   : > { %s1178_s17 = smov %s1001_s28  ;;  %s1179_s18 = smov %s915_s19 }
 0x384   : > { %s1180_s19 = smov %s1182_s23  ;;  %17 = sbr.rel (!%p15_p9) target bundleno = 4 (0x4), region = 79 }
 0x389   :  { %679 = vsyncpa [#allocation3], 1 }
 0x38a   :  { %681 = vsyncpa [#allocation3 + $0x1], 1 }

</bundles_post_ra>
